<compile_context>
chip_gen: v7x
topology: tpu7x:2x2x1
jax: 0.10.0
libtpu: 0.0.40
codegen_flags: <defaults>
</compile_context>

<pallas_src>
import math

import jax
import jax.numpy as jnp
from jax.experimental import pallas as pl
from jax.experimental.pallas import tpu as pltpu


def _round_up(x, m):
    return (x + m - 1) // m * m


def _cdiv(a, b):
    return (a + b - 1) // b


def _vmem_capacity_bytes():
    try:
        info = pltpu.get_tpu_info()
        cap = int(getattr(info, "vmem_capacity_bytes", 0))
        if cap > 0:
            return cap
    except Exception:
        pass
    return 64 << 20  # conservative fallback: v7x per-TensorCore VMEM


def _pick_row_tile(M, per_row_bytes, fixed_bytes, budget_bytes, tm_max):
    """Largest 128-multiple row tile fitting the VMEM budget, with >=2 grid steps."""
    if M < 128:
        return _round_up(max(M, 8), 8)
    tm = min(tm_max, _round_up(M, 128))
    while tm > 128 and fixed_bytes + tm * per_row_bytes > budget_bytes:
        tm -= 128
    # Keep at least 2 (preferably 4) grid steps so v7x's second TensorCore has
    # work and the pipeline has something to overlap (free on v5e/v6e).
    if M >= 4 * 256:
        tm = min(tm, _round_up(_cdiv(M, 4), 128))
    elif M > 128:
        tm = min(tm, _round_up(_cdiv(M, 2), 128))
    # Prefer a tile dividing the 128-padded row count (avoids extra x padding).
    m128 = _round_up(M, 128)
    for cand in range(tm, 127, -128):
        if m128 % cand == 0:
            return cand
    return tm


# ---------------------------------------------------------------------------
# Kernel
# ---------------------------------------------------------------------------
def _sed_doa_kernel(x_ref,
                    w1s_ref, b1s_ref, w2s_ref, b2s_ref,
                    w1d_ref, b1d_ref, w2d_ref, b2d_ref,
                    sed_ref, doa_ref):
    cdt = w1s_ref.dtype                      # compute dtype (bf16 on the fast path)
    x = x_ref[...].astype(cdt)

    # --- SED branch: Linear -> Linear -> sigmoid ---------------------------
    # sigmoid(z) = 0.5*tanh(z/2) + 0.5 ; the 0.5 pre-scale is already folded
    # into w2s/b2s at prep time, so a single tanh suffices.
    hs = jnp.dot(x, w1s_ref[...], preferred_element_type=jnp.float32) + b1s_ref[...]
    zs = jnp.dot(hs.astype(cdt), w2s_ref[...],
                 preferred_element_type=jnp.float32) + b2s_ref[...]
    sed_ref[...] = (0.5 * jnp.tanh(zs) + 0.5).astype(sed_ref.dtype)

    # --- DOA branch: Linear -> Linear -> tanh -------------------------------
    hd = jnp.dot(x, w1d_ref[...], preferred_element_type=jnp.float32) + b1d_ref[...]
    zd = jnp.dot(hd.astype(cdt), w2d_ref[...],
                 preferred_element_type=jnp.float32) + b2d_ref[...]
    doa_ref[...] = jnp.tanh(zd).astype(doa_ref.dtype)


# ---------------------------------------------------------------------------
# One-time parameter preparation (hoisted out of the forward call)
# ---------------------------------------------------------------------------
def prepare_params(params, compute_dtype=jnp.bfloat16):
    """Pad / cast / pre-scale the raw weights once.  Call at init time."""
    w1s, b1s, w2s, b2s, w1d, b1d, w2d, b2d = params
    C, F = w1s.shape
    nc = w2s.shape[1]
    nd = w2d.shape[1]                        # 3 * nc
    F_pad = _round_up(F, 128)                # lane-align the hidden width
    NS_pad = _round_up(nc, 128)              # SED output lanes
    ND_pad = _round_up(nd, 128)              # DOA output lanes

    def pad_to(a, shape):
        return jnp.pad(a, [(0, s - d) for s, d in zip(shape, a.shape)])

    weights = (
        pad_to(w1s, (C, F_pad)).astype(compute_dtype),
        pad_to(b1s.reshape(1, -1), (1, F_pad)).astype(jnp.float32),
        pad_to(0.5 * w2s, (F_pad, NS_pad)).astype(compute_dtype),   # 0.5 pre-scale
        pad_to(0.5 * b2s.reshape(1, -1), (1, NS_pad)).astype(jnp.float32),
        pad_to(w1d, (C, F_pad)).astype(compute_dtype),
        pad_to(b1d.reshape(1, -1), (1, F_pad)).astype(jnp.float32),
        pad_to(w2d, (F_pad, ND_pad)).astype(compute_dtype),
        pad_to(b2d.reshape(1, -1), (1, ND_pad)).astype(jnp.float32),
    )
    return {"weights": weights, "nc": nc, "nd": nd}


# ---------------------------------------------------------------------------
# Forward wrapper
# ---------------------------------------------------------------------------
def sed_doa_head(x, prepped, *, tm_max=1024):
    """x: (B, T, C).  prepped: output of prepare_params.  Returns (B,T,4*nc)."""
    w1s, b1s, w2s, b2s, w1d, b1d, w2d, b2d = prepped["weights"]
    nc, nd = prepped["nc"], prepped["nd"]
    B, T, C = x.shape
    assert w1s.shape[0] == C, (w1s.shape, C)
    M = B * T
    F_pad = w1s.shape[1]
    NS_pad = w2s.shape[1]
    ND_pad = w2d.shape[1]
    out_dtype = x.dtype

    x_item = jnp.dtype(x.dtype).itemsize
    w_item = jnp.dtype(w1s.dtype).itemsize
    o_item = jnp.dtype(out_dtype).itemsize

    # --- VMEM accounting (weights are resident; default pipelining keeps 2
    # copies even though their block index never changes) --------------------
    # TODO(synk): single-buffer the constant weight/bias operands
    # (pipeline_mode=pl.Buffered(1)) to halve their VMEM footprint on v7x.
    vmem_cap = _vmem_capacity_bytes()
    budget = vmem_cap // 2                              # headroom for Mosaic scratch
    fixed = 2 * w_item * (2 * C * F_pad + F_pad * (NS_pad + ND_pad))   # weights x2
    fixed += 2 * 4 * (2 * F_pad + NS_pad + ND_pad)                     # biases  x2
    fixed += 2 << 20                                                   # slack
    per_row = 2 * C * x_item                            # x tile (double-buffered)
    per_row += 2 * (NS_pad + ND_pad) * o_item           # out tiles (double-buffered)
    per_row += 2 * F_pad * (4 + w_item)                 # hs/hd f32 + cast copies
    per_row += (NS_pad + ND_pad) * 8                    # zs/zd + activation temps

    tm = _pick_row_tile(M, per_row, fixed, budget, tm_max)
    M_pad = _round_up(M, tm)

    x2d = x.reshape(M, C)
    if M_pad != M:
        x2d = jnp.pad(x2d, ((0, M_pad - M), (0, 0)))

    full = lambda shape: pl.BlockSpec(shape, lambda i: (0, 0))

    cost = pl.CostEstimate(
        flops=2 * M_pad * (2 * C * F_pad + F_pad * (NS_pad + ND_pad)),
        transcendentals=M_pad * (NS_pad + ND_pad),
        bytes_accessed=(x2d.size * x_item
                        + w_item * (2 * C * F_pad + F_pad * (NS_pad + ND_pad))
                        + 4 * (2 * F_pad + NS_pad + ND_pad)
                        + M_pad * (NS_pad + ND_pad) * o_item),
    )

    sed, doa = pl.pallas_call(
        _sed_doa_kernel,
        out_shape=(jax.ShapeDtypeStruct((M_pad, NS_pad), out_dtype),
                   jax.ShapeDtypeStruct((M_pad, ND_pad), out_dtype)),
        grid_spec=pltpu.PrefetchScalarGridSpec(
            num_scalar_prefetch=0,
            grid=(M_pad // tm,),
            in_specs=[
                pl.BlockSpec((tm, C), lambda i: (i, 0)),    # x rows (tiled)
                full((C, F_pad)), full((1, F_pad)),          # SED layer 1
                full((F_pad, NS_pad)), full((1, NS_pad)),    # SED layer 2 (0.5-scaled)
                full((C, F_pad)), full((1, F_pad)),          # DOA layer 1
                full((F_pad, ND_pad)), full((1, ND_pad)),    # DOA layer 2
            ],
            out_specs=[pl.BlockSpec((tm, NS_pad), lambda i: (i, 0)),
                       pl.BlockSpec((tm, ND_pad), lambda i: (i, 0))],
        ),
        compiler_params=pltpu.CompilerParams(
            dimension_semantics=("parallel",),               # megacore-shardable
            vmem_limit_bytes=int(vmem_cap * 0.8)),
        cost_estimate=cost,
    )(x2d, w1s, b1s, w2s, b2s, w1d, b1d, w2d, b2d)

    # Strip row padding + lane padding and restore (B, T, nc + 3*nc).
    out = jnp.concatenate([sed[:M, :nc], doa[:M, :nd]], axis=-1)
    return out.reshape(B, T, nc + nd)


# ---------------------------------------------------------------------------
# Init + pure-JAX reference (mirrors the PyTorch module)
# ---------------------------------------------------------------------------
def _xavier_uniform(key, fan_in, fan_out, dtype=jnp.float32):
    bound = math.sqrt(6.0 / (fan_in + fan_out))
    return jax.random.uniform(key, (fan_in, fan_out), dtype, -bound, bound)


def init_params(key, enc_out_dim, ffn_dim, nb_classes):
    k1, k2, k3, k4 = jax.random.split(key, 4)
    w1s = _xavier_uniform(k1, enc_out_dim, ffn_dim)
    b1s = jnp.zeros((1, ffn_dim), jnp.float32)
    w2s = _xavier_uniform(k2, ffn_dim, nb_classes)
    b2s = jnp.zeros((1, nb_classes), jnp.float32)
    w1d = _xavier_uniform(k3, enc_out_dim, ffn_dim)
    b1d = jnp.zeros((1, ffn_dim), jnp.float32)
    w2d = _xavier_uniform(k4, ffn_dim, 3 * nb_classes)
    b2d = jnp.zeros((1, 3 * nb_classes), jnp.float32)
    return (w1s, b1s, w2s, b2s, w1d, b1d, w2d, b2d)


def reference(x, params):
    w1s, b1s, w2s, b2s, w1d, b1d, w2d, b2d = params
    sed = jax.nn.sigmoid((x @ w1s + b1s) @ w2s + b2s)
    doa = jnp.tanh((x @ w1d + b1d) @ w2d + b2d)
    return jnp.concatenate([sed, doa], axis=-1)


if __name__ == "__main__":
    B, T = 2, 8
    enc_out_dim, ffn_dim, nb_classes = 32, 64, 4

    key = jax.random.PRNGKey(0)
    kx, kp = jax.random.split(key)
    x = jax.random.normal(kx, (B, T, enc_out_dim), jnp.float32)
    params = init_params(kp, enc_out_dim, ffn_dim, nb_classes)
    ref = reference(x, params)

    # Exact-path check: f32 compute dtype, tight tolerance vs. reference.
    prep_f32 = prepare_params(params, compute_dtype=jnp.float32)
    out_f32 = jax.block_until_ready(sed_doa_head(x, prep_f32))
    assert out_f32.shape == (B, T, 4 * nb_classes), out_f32.shape
    assert jnp.allclose(out_f32, ref, atol=1e-4, rtol=1e-4), "f32 path mismatch"

    # Performance path: bf16 MXU operands with f32 accumulation.
    prep_bf16 = prepare_params(params)                      # bf16 weights
    out_bf16 = jax.block_until_ready(sed_doa_head(x, prep_bf16))
    assert out_bf16.shape == (B, T, 4 * nb_classes), out_bf16.shape
    assert float(jnp.max(jnp.abs(out_bf16 - ref))) < 5e-2, "bf16 path out of tolerance"

    print("KERNEL_OK")
</pallas_src>

<mosaic_0001>
module attributes {stable_mosaic.version = 11 : i64} {
  func.func @_sed_doa_kernel(%arg0: i32, %arg1: memref<16x32xf32, #tpu.memory_space<vmem>>, %arg2: memref<32x128xf32, #tpu.memory_space<vmem>>, %arg3: memref<1x128xf32, #tpu.memory_space<vmem>>, %arg4: memref<128x128xf32, #tpu.memory_space<vmem>>, %arg5: memref<1x128xf32, #tpu.memory_space<vmem>>, %arg6: memref<32x128xf32, #tpu.memory_space<vmem>>, %arg7: memref<1x128xf32, #tpu.memory_space<vmem>>, %arg8: memref<128x128xf32, #tpu.memory_space<vmem>>, %arg9: memref<1x128xf32, #tpu.memory_space<vmem>>, %arg10: memref<16x128xf32, #tpu.memory_space<vmem>>, %arg11: memref<16x128xf32, #tpu.memory_space<vmem>>) attributes {dimension_semantics = [#tpu.dimension_semantics<parallel>], iteration_bounds = array<i64: 1>, scalar_prefetch = 0 : i64, scratch_operands = 0 : i64, tpu.core_type = #tpu.core_type<tc>, window_params = [{transform_indices = @transform_0, window_bounds = array<i64: 16, 32>}, {pipeline_mode = #tpu.pipeline_mode<synchronous>, transform_indices = @transform_1, window_bounds = array<i64: 32, 128>}, {pipeline_mode = #tpu.pipeline_mode<synchronous>, transform_indices = @transform_2, window_bounds = array<i64: 1, 128>}, {pipeline_mode = #tpu.pipeline_mode<synchronous>, transform_indices = @transform_3, window_bounds = array<i64: 128, 128>}, {pipeline_mode = #tpu.pipeline_mode<synchronous>, transform_indices = @transform_4, window_bounds = array<i64: 1, 128>}, {pipeline_mode = #tpu.pipeline_mode<synchronous>, transform_indices = @transform_5, window_bounds = array<i64: 32, 128>}, {pipeline_mode = #tpu.pipeline_mode<synchronous>, transform_indices = @transform_6, window_bounds = array<i64: 1, 128>}, {pipeline_mode = #tpu.pipeline_mode<synchronous>, transform_indices = @transform_7, window_bounds = array<i64: 128, 128>}, {pipeline_mode = #tpu.pipeline_mode<synchronous>, transform_indices = @transform_8, window_bounds = array<i64: 1, 128>}, {transform_indices = @transform_9, window_bounds = array<i64: 16, 128>}, {transform_indices = @transform_10, window_bounds = array<i64: 16, 128>}]} {
    %c0 = arith.constant 0 : index
    %c0_0 = arith.constant 0 : index
    %0 = vector.load %arg1[%c0, %c0_0] : memref<16x32xf32, #tpu.memory_space<vmem>>, vector<16x32xf32>
    %c0_1 = arith.constant 0 : index
    %c0_2 = arith.constant 0 : index
    %1 = vector.load %arg2[%c0_1, %c0_2] : memref<32x128xf32, #tpu.memory_space<vmem>>, vector<32x128xf32>
    %cst = arith.constant dense<0.000000e+00> : vector<16x128xf32>
    %2 = tpu.matmul %0, %1, %cst {dimension_numbers = #tpu.dot_dimension_numbers<[1], [0], [0], [1], [0, 0, 1, 1], [], []>} : vector<16x32xf32>, vector<32x128xf32>, vector<16x128xf32> -> vector<16x128xf32>
    %c0_3 = arith.constant 0 : index
    %c0_4 = arith.constant 0 : index
    %3 = vector.load %arg3[%c0_3, %c0_4] : memref<1x128xf32, #tpu.memory_space<vmem>>, vector<1x128xf32>
    %4 = vector.broadcast %3 : vector<1x128xf32> to vector<16x128xf32>
    %5 = arith.addf %2, %4 : vector<16x128xf32>
    %c0_5 = arith.constant 0 : index
    %c0_6 = arith.constant 0 : index
    %6 = vector.load %arg4[%c0_5, %c0_6] : memref<128x128xf32, #tpu.memory_space<vmem>>, vector<128x128xf32>
    %cst_7 = arith.constant dense<0.000000e+00> : vector<16x128xf32>
    %7 = tpu.matmul %5, %6, %cst_7 {dimension_numbers = #tpu.dot_dimension_numbers<[1], [0], [0], [1], [0, 0, 1, 1], [], []>} : vector<16x128xf32>, vector<128x128xf32>, vector<16x128xf32> -> vector<16x128xf32>
    %c0_8 = arith.constant 0 : index
    %c0_9 = arith.constant 0 : index
    %8 = vector.load %arg5[%c0_8, %c0_9] : memref<1x128xf32, #tpu.memory_space<vmem>>, vector<1x128xf32>
    %9 = vector.broadcast %8 : vector<1x128xf32> to vector<16x128xf32>
    %10 = arith.addf %7, %9 : vector<16x128xf32>
    %11 = math.tanh %10 : vector<16x128xf32>
    %cst_10 = arith.constant 5.000000e-01 : f32
    %12 = vector.broadcast %cst_10 : f32 to vector<16x128xf32>
    %13 = arith.mulf %12, %11 : vector<16x128xf32>
    %cst_11 = arith.constant 5.000000e-01 : f32
    %14 = vector.broadcast %cst_11 : f32 to vector<16x128xf32>
    %15 = arith.addf %13, %14 : vector<16x128xf32>
    %c0_12 = arith.constant 0 : index
    %c0_13 = arith.constant 0 : index
    %16 = vector.load %arg10[%c0_12, %c0_13] : memref<16x128xf32, #tpu.memory_space<vmem>>, vector<16x128xf32>
    tpu.vector_store %arg10[%c0_12, %c0_13], %15 {strides = array<i32>} : memref<16x128xf32, #tpu.memory_space<vmem>>, vector<16x128xf32>,
    %c0_14 = arith.constant 0 : index
    %c0_15 = arith.constant 0 : index
    %17 = vector.load %arg6[%c0_14, %c0_15] : memref<32x128xf32, #tpu.memory_space<vmem>>, vector<32x128xf32>
    %cst_16 = arith.constant dense<0.000000e+00> : vector<16x128xf32>
    %18 = tpu.matmul %0, %17, %cst_16 {dimension_numbers = #tpu.dot_dimension_numbers<[1], [0], [0], [1], [0, 0, 1, 1], [], []>} : vector<16x32xf32>, vector<32x128xf32>, vector<16x128xf32> -> vector<16x128xf32>
    %c0_17 = arith.constant 0 : index
    %c0_18 = arith.constant 0 : index
    %19 = vector.load %arg7[%c0_17, %c0_18] : memref<1x128xf32, #tpu.memory_space<vmem>>, vector<1x128xf32>
    %20 = vector.broadcast %19 : vector<1x128xf32> to vector<16x128xf32>
    %21 = arith.addf %18, %20 : vector<16x128xf32>
    %c0_19 = arith.constant 0 : index
    %c0_20 = arith.constant 0 : index
    %22 = vector.load %arg8[%c0_19, %c0_20] : memref<128x128xf32, #tpu.memory_space<vmem>>, vector<128x128xf32>
    %cst_21 = arith.constant dense<0.000000e+00> : vector<16x128xf32>
    %23 = tpu.matmul %21, %22, %cst_21 {dimension_numbers = #tpu.dot_dimension_numbers<[1], [0], [0], [1], [0, 0, 1, 1], [], []>} : vector<16x128xf32>, vector<128x128xf32>, vector<16x128xf32> -> vector<16x128xf32>
    %c0_22 = arith.constant 0 : index
    %c0_23 = arith.constant 0 : index
    %24 = vector.load %arg9[%c0_22, %c0_23] : memref<1x128xf32, #tpu.memory_space<vmem>>, vector<1x128xf32>
    %25 = vector.broadcast %24 : vector<1x128xf32> to vector<16x128xf32>
    %26 = arith.addf %23, %25 : vector<16x128xf32>
    %27 = math.tanh %26 : vector<16x128xf32>
    %c0_24 = arith.constant 0 : index
    %c0_25 = arith.constant 0 : index
    %28 = vector.load %arg11[%c0_24, %c0_25] : memref<16x128xf32, #tpu.memory_space<vmem>>, vector<16x128xf32>
    tpu.vector_store %arg11[%c0_24, %c0_25], %27 {strides = array<i32>} : memref<16x128xf32, #tpu.memory_space<vmem>>, vector<16x128xf32>,
    return
  }
  func.func @transform_0(%arg0: i32) -> (i32, i32) {
    %c0_i32 = arith.constant 0 : i32
    %c0_i32_0 = arith.constant 0 : i32
    return %arg0, %c0_i32 : i32, i32
  }
  func.func @transform_1(%arg0: i32) -> (i32, i32) {
    %c0_i32 = arith.constant 0 : i32
    %c0_i32_0 = arith.constant 0 : i32
    %c0_i32_1 = arith.constant 0 : i32
    return %c0_i32, %c0_i32_0 : i32, i32
  }
  func.func @transform_2(%arg0: i32) -> (i32, i32) {
    %c0_i32 = arith.constant 0 : i32
    %c0_i32_0 = arith.constant 0 : i32
    %c0_i32_1 = arith.constant 0 : i32
    return %c0_i32, %c0_i32_0 : i32, i32
  }
  func.func @transform_3(%arg0: i32) -> (i32, i32) {
    %c0_i32 = arith.constant 0 : i32
    %c0_i32_0 = arith.constant 0 : i32
    %c0_i32_1 = arith.constant 0 : i32
    return %c0_i32, %c0_i32_0 : i32, i32
  }
  func.func @transform_4(%arg0: i32) -> (i32, i32) {
    %c0_i32 = arith.constant 0 : i32
    %c0_i32_0 = arith.constant 0 : i32
    %c0_i32_1 = arith.constant 0 : i32
    return %c0_i32, %c0_i32_0 : i32, i32
  }
  func.func @transform_5(%arg0: i32) -> (i32, i32) {
    %c0_i32 = arith.constant 0 : i32
    %c0_i32_0 = arith.constant 0 : i32
    %c0_i32_1 = arith.constant 0 : i32
    return %c0_i32, %c0_i32_0 : i32, i32
  }
  func.func @transform_6(%arg0: i32) -> (i32, i32) {
    %c0_i32 = arith.constant 0 : i32
    %c0_i32_0 = arith.constant 0 : i32
    %c0_i32_1 = arith.constant 0 : i32
    return %c0_i32, %c0_i32_0 : i32, i32
  }
  func.func @transform_7(%arg0: i32) -> (i32, i32) {
    %c0_i32 = arith.constant 0 : i32
    %c0_i32_0 = arith.constant 0 : i32
    %c0_i32_1 = arith.constant 0 : i32
    return %c0_i32, %c0_i32_0 : i32, i32
  }
  func.func @transform_8(%arg0: i32) -> (i32, i32) {
    %c0_i32 = arith.constant 0 : i32
    %c0_i32_0 = arith.constant 0 : i32
    %c0_i32_1 = arith.constant 0 : i32
    return %c0_i32, %c0_i32_0 : i32, i32
  }
  func.func @transform_9(%arg0: i32) -> (i32, i32) {
    %c0_i32 = arith.constant 0 : i32
    %c0_i32_0 = arith.constant 0 : i32
    return %arg0, %c0_i32 : i32, i32
  }
  func.func @transform_10(%arg0: i32) -> (i32, i32) {
    %c0_i32 = arith.constant 0 : i32
    %c0_i32_0 = arith.constant 0 : i32
    return %arg0, %c0_i32 : i32, i32
  }
}

</mosaic_0001>

<bundles_post_ra>
// kernel: tpu_custom_call.1
= control target key start
LH: loop header
LB: loop body
LE: loop exit
PB: predicated region body
PF: predicated region fallthrough
CT: control target
= control target key end

     0   :  { %16 = vsyncpa [#allocation3], 0  ;;  %s1143_s0 = inlined_call_operand.hbm [shape: f32[16,32], index: 0, kind: input, shape index: {}]   ;;  %s1144_s1 = inlined_call_operand.hbm [shape: f32[32,128], index: 1, kind: input, shape index: {}]   ;;  %s1145_s2 = inlined_call_operand.vmem [shape: f32[1,128], index: 2, kind: input, shape index: {}]   ;;  %s1146_s3 = inlined_call_operand.hbm [shape: f32[128,128], index: 3, kind: input, shape index: {}]   ;;  %s1147_s4 = inlined_call_operand.vmem [shape: f32[1,128], index: 4, kind: input, shape index: {}]   ;;  %s1148_s5 = inlined_call_operand.hbm [shape: f32[32,128], index: 5, kind: input, shape index: {}]   ;;  %s1149_s6 = inlined_call_operand.vmem [shape: f32[1,128], index: 6, kind: input, shape index: {}]   ;;  %s1150_s7 = inlined_call_operand.hbm [shape: f32[128,128], index: 7, kind: input, shape index: {}]   ;;  %s1151_s8 = inlined_call_operand.vmem [shape: f32[1,128], index: 8, kind: input, shape index: {}]   ;;  %s1152_s9 = inlined_call_operand.hbm [shape: f32[16,128], index: 9, kind: output, shape index: {0}]   ;;  %s1153_s10 = inlined_call_operand.hbm [shape: f32[16,128], index: 10, kind: output, shape index: {1}]  }
   0x1   :  { %17 = vsyncpa [#allocation6], 0 }
   0x2   :  { %18 = vsyncpa [#allocation9], 0 }
   0x3   :  { %19 = vsyncpa [#allocation4], 0 }
   0x4   :  { %20 = vsyncpa [#allocation13], 0  ;;  %s937_s13 = smov [#allocation5]   ;;  %s938_s15 = smov [#allocation8]  }
   0x5   :  { %s38_s14 = sshll.u32 %s937_s13, 4  ;;  %s66_s16 = sshll.u32 %s938_s15, 4  ;;  %s39_s14 = int_to_ptr.vmem [resolvable:$true] %s38_s14  ;;  %s1001_s16 = int_to_ptr.vmem [resolvable:$true] %s66_s16 }
   0x6   :  { %s773_s19 = scalar_lea.hbm %s1144_s1, 512 }
   0x7   :  { %p774_p0 = scmp.ne.s32.totalorder %s1144_s1, %s773_s19  ;;  %p777_p1 = scmp.lt.u32.totalorder %s773_s19, %s1144_s1 }
   0x9   :  { %p779_p2 = pnand %p777_p1, %p774_p0 }
   0xb   :  { %782 = shalt.err (!%p779_p2)
}
   0xc   :  { %s783_s24 = scalar_lea.vmem %s39_s14, 512  ;;  %p788_p4 = scmp.lt.s32.totalorder %s39_s14, %s39_s14 }
   0xd   :  { %p784_p3 = scmp.ne.s32.totalorder %s39_s14, %s783_s24  ;;  %p789_p5 = scmp.lt.s32.totalorder %s783_s24, %s783_s24 }
   0xf   :  { %p790_p6 = por %p789_p5, %p788_p4 }
  0x11   :  { %p791_p7 = pnand %p790_p6, %p784_p3 }
  0x13   :  { %794 = shalt.err (!%p791_p7)
}
  0x14   :  { %s939_s25 = smov 128   ;;  %s940_s26 = smov 8  }
  0x15   :  { %44 = dma.hbm_to_vmem [thread:$0]  %s1144_s1, 512, %s39_s14, [#allocation6], %s939_s25, %s939_s25, %s940_s26  }
  0x16   :  { %s795_s11 = scalar_lea.hbm %s1148_s5, 512 }
  0x17   :  { %p796_p8 = scmp.ne.s32.totalorder %s1148_s5, %s795_s11  ;;  %p799_p9 = scmp.lt.u32.totalorder %s795_s11, %s1148_s5 }
  0x19   :  { %p801_p10 = pnand %p799_p9, %p796_p8 }
  0x1b   :  { %804 = shalt.err (!%p801_p10)
}
  0x1c   :  { %s805_s18 = scalar_lea.vmem %s1001_s16, 512  ;;  %p810_p12 = scmp.lt.s32.totalorder %s1001_s16, %s1001_s16 }
  0x1d   :  { %p806_p11 = scmp.ne.s32.totalorder %s1001_s16, %s805_s18  ;;  %p811_p13 = scmp.lt.s32.totalorder %s805_s18, %s805_s18 }
  0x1f   :  { %p812_p0 = por %p811_p13, %p810_p12 }
  0x21   :  { %p813_p1 = pnand %p812_p0, %p806_p11 }
  0x23   :  { %816 = shalt.err (!%p813_p1)
}
  0x24   :  { %72 = dma.hbm_to_vmem [thread:$0]  %s1148_s5, 512, %s1001_s16, [#allocation9], %s939_s25, %s939_s25, %s940_s26  }
  0x25   :  { %s941_s19 = smov [#allocation2]   ;;  %s942_s21 = smov [#allocation7]  }
  0x26   :  { %s26_s20 = sshll.u32 %s941_s19, 4  ;;  %s52_s22 = sshll.u32 %s942_s21, 4  ;;  %s27_s20 = int_to_ptr.vmem [resolvable:$true] %s26_s20  ;;  %s1038_s22 = int_to_ptr.vmem [resolvable:$true] %s52_s22 }
  0x27   :  { %s817_s27 = scalar_lea.hbm %s1143_s0, 256 }
  0x28   :  { %p818_p2 = scmp.ne.s32.totalorder %s1143_s0, %s817_s27  ;;  %p821_p3 = scmp.lt.u32.totalorder %s817_s27, %s1143_s0 }
  0x2a   :  { %p823_p4 = pnand %p821_p3, %p818_p2 }
  0x2c   :  { %826 = shalt.err (!%p823_p4)
}
  0x2d   :  { %s827_s5 = scalar_lea.vmem %s27_s20, 256  ;;  %p832_p6 = scmp.lt.s32.totalorder %s27_s20, %s27_s20 }
  0x2e   :  { %p828_p5 = scmp.ne.s32.totalorder %s27_s20, %s827_s5  ;;  %p833_p7 = scmp.lt.s32.totalorder %s827_s5, %s827_s5 }
  0x30   :  { %p834_p8 = por %p833_p7, %p832_p6 }
  0x32   :  { %p835_p9 = pnand %p834_p8, %p828_p5 }
  0x34   :  { %838 = shalt.err (!%p835_p9)
}
  0x35   :  { %32 = dma.hbm_to_vmem [thread:$0]  %s1143_s0, 256, %s27_s20, [#allocation3], %s939_s25, %s939_s25, %s940_s26  }
  0x36   :  { %s839_s17 = scalar_lea.hbm %s1146_s3, 2048 }
  0x37   :  { %p840_p10 = scmp.ne.s32.totalorder %s1146_s3, %s839_s17  ;;  %p843_p11 = scmp.lt.u32.totalorder %s839_s17, %s1146_s3 }
  0x39   :  { %p845_p12 = pnand %p843_p11, %p840_p10 }
  0x3b   :  { %848 = shalt.err (!%p845_p12)
}
  0x3c   :  { %s849_s21 = scalar_lea.vmem %s1038_s22, 2048  ;;  %p854_p0 = scmp.lt.s32.totalorder %s1038_s22, %s1038_s22 }
  0x3d   :  { %p850_p13 = scmp.ne.s32.totalorder %s1038_s22, %s849_s21  ;;  %p855_p1 = scmp.lt.s32.totalorder %s849_s21, %s849_s21 }
  0x3f   :  { %p856_p2 = por %p855_p1, %p854_p0 }
  0x41   :  { %p857_p3 = pnand %p856_p2, %p850_p13 }
  0x43   :  { %860 = shalt.err (!%p857_p3)
}
  0x44   :  { %58 = dma.hbm_to_vmem [thread:$0]  %s1146_s3, 2048, %s1038_s22, [#allocation6], %s939_s25, %s939_s25, %s940_s26  }
  0x45   :  { %s943_s23 = smov [#allocation10]   ;;  %s861_s29 = scalar_lea.hbm %s1150_s7, 2048 }
  0x46   :  { %s80_s24 = sshll.u32 %s943_s23, 4  ;;  %p862_p4 = scmp.ne.s32.totalorder %s1150_s7, %s861_s29  ;;  %s81_s24 = int_to_ptr.vmem [resolvable:$true] %s80_s24 }
  0x47   :  { %p865_p5 = scmp.lt.u32.totalorder %s861_s29, %s1150_s7 }
  0x49   :  { %p867_p6 = pnand %p865_p5, %p862_p4 }
  0x4b   :  { %870 = shalt.err (!%p867_p6)
}
  0x4c   :  { %s871_s12 = scalar_lea.vmem %s81_s24, 2048  ;;  %p876_p8 = scmp.lt.s32.totalorder %s81_s24, %s81_s24 }
  0x4d   :  { %p872_p7 = scmp.ne.s32.totalorder %s81_s24, %s871_s12  ;;  %p877_p9 = scmp.lt.s32.totalorder %s871_s12, %s871_s12 }
  0x4f   :  { %p878_p10 = por %p877_p9, %p876_p8 }
  0x51   :  { %p879_p11 = pnand %p878_p10, %p872_p7 }
  0x53   :  { %882 = shalt.err (!%p879_p11)
}
  0x54   :  { %86 = dma.hbm_to_vmem [thread:$0]  %s1150_s7, 2048, %s81_s24, [#allocation9], %s939_s25, %s939_s25, %s940_s26  }
  0x55   :  { %927 = dma.done.wait [#allocation3], 256  }
  0x56   :  { %928 = vsyncadd [#allocation3], 4294967040 }
  0x57   :  { %929 = dma.done.wait [#allocation6], 2560  }
  0x58   :  { %930 = vsyncadd [#allocation6], 4294964736 }
  0x59   :  { %931 = dma.done.wait [#allocation9], 2560  }
  0x5a   :  { %932 = vsyncadd [#allocation9], 4294964736  ;;  %v106_v0 = vld [vmem:[#allocation5] sm:$0xff]  ;;  %v107_v1 = vld [vmem:[#allocation5 + $0x8] sm:$0xff]  ;;  %vm117_vm0 = vcmask 261120  }
  0x5b   :  { %v305_v2 = vld [vmem:[#allocation8] sm:$0xff]  ;;  %v676_v3 = vpack.c.bf16 %v107_v1, %v106_v0  ;;  %v306_v4 = vld [vmem:[#allocation8 + $0x8] sm:$0xff]  ;;  %v108_v5 = vld [vmem:[#allocation5 + $0x10] sm:$0xff] }
  0x5c   :  { %v109_v6 = vld [vmem:[#allocation5 + $0x18] sm:$0xff]  ;;  %v716_v7 = vpack.c.bf16 %v306_v4, %v305_v2  ;;  %v307_v9 = vld [vmem:[#allocation8 + $0x10] sm:$0xff]  ;;  %v199_v13 = vld [vmem:[#allocation7] sm:$0xff] }
  0x5d   :  { %v680_v8 = vpack.c.bf16 %v109_v6, %v108_v5  ;;  %v308_v10 = vld [vmem:[#allocation8 + $0x18] sm:$0xff]  ;;  %v104_v11 = vld [vmem:[#allocation2] sm:$0xff]  ;;  %677 = vmatprep.subr.bf16.mxu1 %v676_v3  ;;  %v200_v14 = vld [vmem:[#allocation7 + $0x8] sm:$0xff] }
  0x5e   :  { %v720_v12 = vpack.c.bf16 %v308_v10, %v307_v9  ;;  %592 = vmatprep.mubr.msk.f32.mxu1 %vm117_vm0, %v104_v11  ;;  %679 = vmatpush3.bf16.msra.mxu1 %v676_v3  ;;  %v391_v15 = vld [vmem:[#allocation10] sm:$0xff]  ;;  %v392_v16 = vld [vmem:[#allocation10 + $0x8] sm:$0xff]  ;;  %v684_v17 = vpack.c.bf16 %v200_v14, %v199_v13  ;;  %v201_v19 = vld [vmem:[#allocation7 + $0x10] sm:$0xff] }
  0x5f   :  { %717 = vmatprep.subr.bf16.mxu0 %v716_v7  ;;  %681 = vmatprep.subr.bf16.mxu1 %v680_v8  ;;  %v724_v18 = vpack.c.bf16 %v392_v16, %v391_v15  ;;  %v202_v20 = vld [vmem:[#allocation7 + $0x18] sm:$0xff]  ;;  %v393_v21 = vld [vmem:[#allocation10 + $0x10] sm:$0xff]  ;;  %v203_v26 = vld [vmem:[#allocation7 + $0x20] sm:$0xff] }
  0x60   :  { %719 = vmatpush3.bf16.msra.mxu0 %v716_v7  ;;  %638 = vmatprep.mubr.msk.f32.mxu0 %vm117_vm0, %v104_v11  ;;  %v394_v22 = vld [vmem:[#allocation10 + $0x18] sm:$0xff]  ;;  %v688_v24 = vpack.c.bf16 %v202_v20, %v201_v19  ;;  %v204_v27 = vld [vmem:[#allocation7 + $0x28] sm:$0xff]  ;;  %v395_v28 = vld [vmem:[#allocation10 + $0x20] sm:$0xff] }
  0x61   :  { %721 = vmatprep.subr.bf16.mxu0 %v720_v12  ;;  %v105_v23 = vld [vmem:[#allocation2 + $0x8] sm:$0xff]  ;;  %v728_v25 = vpack.c.bf16 %v394_v22, %v393_v21  ;;  %v396_v29 = vld [vmem:[#allocation10 + $0x28] sm:$0xff]  ;;  %v692_v30 = vpack.c.bf16 %v204_v27, %v203_v26  ;;  %v205_v32 = vld [vmem:[#allocation7 + $0x30] sm:$0xff] }
  0x62   :  { %683 = vmatpush3.bf16.msra.mxu1 %v680_v8  ;;  %v732_v31 = vpack.c.bf16 %v396_v29, %v395_v28  ;;  %v206_v33 = vld [vmem:[#allocation7 + $0x38] sm:$0xff]  ;;  %v397_v34 = vld [vmem:[#allocation10 + $0x30] sm:$0xff]  ;;  %v207_v38 = vld [vmem:[#allocation7 + $0x40] sm:$0xff] }
  0x63   :  { %685 = vmatprep.subr.bf16.mxu1 %v684_v17  ;;  %v398_v35 = vld [vmem:[#allocation10 + $0x38] sm:$0xff]  ;;  %v696_v36 = vpack.c.bf16 %v206_v33, %v205_v32  ;;  %v208_v39 = vld [vmem:[#allocation7 + $0x48] sm:$0xff]  ;;  %v399_v40 = vld [vmem:[#allocation10 + $0x40] sm:$0xff] }
  0x64   :  { %723 = vmatpush3.bf16.msra.mxu0 %v720_v12  ;;  %v736_v37 = vpack.c.bf16 %v398_v35, %v397_v34  ;;  %v400_v41 = vld [vmem:[#allocation10 + $0x48] sm:$0xff]  ;;  %v700_v42 = vpack.c.bf16 %v208_v39, %v207_v38  ;;  %v209_v44 = vld [vmem:[#allocation7 + $0x50] sm:$0xff]  ;;  %v210_v45 = vld [vmem:[#allocation7 + $0x58] sm:$0xff] }
  0x65   :  { %725 = vmatprep.subr.bf16.mxu0 %v724_v18  ;;  %593 = vmatmul.mubr.msk.f32.vlgmr.msra.gmra.mrb[0].mxu1 %vm117_vm0, %v105_v23  ;;  %v740_v43 = vpack.c.bf16 %v400_v41, %v399_v40  ;;  %v401_v46 = vld [vmem:[#allocation10 + $0x50] sm:$0xff]  ;;  %v402_v47 = vld [vmem:[#allocation10 + $0x58] sm:$0xff]  ;;  %v704_v48 = vpack.c.bf16 %v210_v45, %v209_v44  ;;  %v211_v50 = vld [vmem:[#allocation7 + $0x60] sm:$0xff] }
  0x66   :  { %687 = vmatpush3.bf16.msra.mxu1 %v684_v17  ;;  %v744_v49 = vpack.c.bf16 %v402_v47, %v401_v46  ;;  %v212_v51 = vld [vmem:[#allocation7 + $0x68] sm:$0xff]  ;;  %v403_v52 = vld [vmem:[#allocation10 + $0x60] sm:$0xff]  ;;  %v213_v56 = vld [vmem:[#allocation7 + $0x70] sm:$0xff] }
  0x67   :  { %639 = vmatmul.mubr.msk.f32.vlgmr.msra.gmra.mrb[0].mxu0 %vm117_vm0, %v105_v23  ;;  %689 = vmatprep.subr.bf16.mxu1 %v688_v24  ;;  %v404_v53 = vld [vmem:[#allocation10 + $0x68] sm:$0xff]  ;;  %v708_v54 = vpack.c.bf16 %v212_v51, %v211_v50  ;;  %v214_v57 = vld [vmem:[#allocation7 + $0x78] sm:$0xff]  ;;  %v405_v59 = vld [vmem:[#allocation10 + $0x70] sm:$0xff] }
  0x68   :  { %727 = vmatpush3.bf16.msra.mxu0 %v724_v18  ;;  %v748_v55 = vpack.c.bf16 %v404_v53, %v403_v52  ;;  %v712_v58 = vpack.c.bf16 %v214_v57, %v213_v56  ;;  %v406_v60 = vld [vmem:[#allocation10 + $0x78] sm:$0xff]  ;;  %v528_v62 = vld [vmem:[%s1145_s2] ss:$0 sm:$0xff] }
  0x69   :  { %729 = vmatprep.subr.bf16.mxu0 %v728_v25  ;;  %v752_v61 = vpack.c.bf16 %v406_v60, %v405_v59  ;;  %v532_v63 = vld [vmem:[%s1149_s6] ss:$0 sm:$0xff]  ;;  %s944_s6 = smov [#allocation12]  }
  0x6a   :  { %691 = vmatpush3.bf16.msra.mxu1 %v688_v24  ;;  %v531_v8 = vld [vmem:[%s1147_s4] ss:$0 sm:$0xff]  ;;  %s510_s19 = sshll.u32 %s944_s6, 4  ;;  %s945_s4 = smov [#allocation11]   ;;  %s511_s19 = int_to_ptr.vmem [resolvable:$true] %s510_s19 }
  0x6b   :  { %693 = vmatprep.subr.bf16.mxu1 %v692_v30  ;;  %v535_v9 = vld [vmem:[%s1151_s8] ss:$0 sm:$0xff]  ;;  %s498_s21 = sshll.u32 %s945_s4, 4  ;;  %s883_s8 = scalar_lea.vmem %s511_s19, 256  ;;  %s1106_s21 = int_to_ptr.vmem [resolvable:$true] %s498_s21 }
  0x6c   :  { %731 = vmatpush3.bf16.msra.mxu0 %v728_v25  ;;  %p884_p12 = scmp.ne.s32.totalorder %s511_s19, %s883_s8  ;;  %p888_p13 = scmp.lt.s32.totalorder %s511_s19, %s511_s19 }
  0x6d   :  { %733 = vmatprep.subr.bf16.mxu0 %v732_v31  ;;  %p889_p0 = scmp.lt.s32.totalorder %s883_s8, %s883_s8 }
  0x6e   :  { %695 = vmatpush3.bf16.msra.mxu1 %v692_v30 }
  0x6f   :  { %697 = vmatprep.subr.bf16.mxu1 %v696_v36  ;;  %p890_p1 = por %p889_p0, %p888_p13 }
  0x70   :  { %735 = vmatpush3.bf16.msra.mxu0 %v732_v31 }
  0x71   :  { %737 = vmatprep.subr.bf16.mxu0 %v736_v37  ;;  %p891_p2 = pnand %p890_p1, %p884_p12 }
  0x72   :  { %699 = vmatpush3.bf16.msra.mxu1 %v696_v36 }
  0x73   :  { %701 = vmatprep.subr.bf16.mxu1 %v700_v42 }
  0x74   :  { %739 = vmatpush3.bf16.msra.mxu0 %v736_v37 }
  0x75   :  { %741 = vmatprep.subr.bf16.mxu0 %v740_v43 }
  0x76   :  { %703 = vmatpush3.bf16.msra.mxu1 %v700_v42 }
  0x77   :  { %705 = vmatprep.subr.bf16.mxu1 %v704_v48 }
  0x78   :  { %743 = vmatpush3.bf16.msra.mxu0 %v740_v43 }
  0x79   :  { %745 = vmatprep.subr.bf16.mxu0 %v744_v49 }
  0x7a   :  { %707 = vmatpush3.bf16.msra.mxu1 %v704_v48 }
  0x7b   :  { %709 = vmatprep.subr.bf16.mxu1 %v708_v54 }
  0x7c   :  { %747 = vmatpush3.bf16.msra.mxu0 %v744_v49 }
  0x7d   :  { %749 = vmatprep.subr.bf16.mxu0 %v748_v55 }
  0x7e   :  { %711 = vmatpush3.bf16.msra.mxu1 %v708_v54 }
  0x7f   :  { %713 = vmatprep.subr.bf16.mxu1 %v712_v58 }
  0x80   :  { %751 = vmatpush3.bf16.msra.mxu0 %v748_v55 }
  0x81   :  { %753 = vmatprep.subr.bf16.mxu0 %v752_v61 }
  0x82   :  { %715 = vmatpush3.bf16.msra.mxu1 %v712_v58 }
  0x84   :  { %755 = vmatpush3.bf16.msra.mxu0 %v752_v61 }
 0x138   :  { %v594_v0 = vpop.f32.mrb[0].mxu1 }
 0x139   :  { %v190_v1 = vpop.f32.mrb[1].mxu1  ;;  %v196_v6 = vadd.f32 %v594_v0, %v528_v62 }
 0x13a   :  { %v640_v2 = vpop.f32.mrb[0].mxu0  ;;  %v191_v3 = vadd.f32 %v528_v62, %v190_v1 }
 0x13b   :  { %v388_v4 = vadd.f32 %v640_v2, %v532_v63  ;;  %v382_v5 = vpop.f32.mrb[1].mxu0 }
 0x13c   :  { %v383_v7 = vadd.f32 %v532_v63, %v382_v5  ;;  %627 = vmatprep.mubr.f32.mxu1 %v191_v3 }
 0x13d   :  { %628 = vmatmul.mubr.f32.vlgmr.msra.gmra.mrb[2].mxu1 %v196_v6 }
 0x13e   :  { %673 = vmatprep.mubr.f32.mxu0 %v383_v7 }
 0x13f   :  { %674 = vmatmul.mubr.f32.vlgmr.msra.gmra.mrb[2].mxu0 %v388_v4 }
 0x210   :  { %v629_v10 = vpop.f32.mrb[2].mxu1 }
 0x211   :  { %v294_v11 = vadd.f32 %v629_v10, %v531_v8  ;;  %v288_v12 = vpop.f32.mrb[3].mxu1 }
 0x212   :  { %v675_v13 = vpop.f32.mrb[2].mxu0  ;;  %v289_v14 = vadd.f32 %v531_v8, %v288_v12 }
 0x213   :  { %v486_v15 = vadd.f32 %v675_v13, %v535_v9  ;;  %v480_v16 = vpop.f32.mrb[3].mxu0  ;;  %765 = vtanh.f32 %v294_v11 }
 0x214   :  { %v481_v17 = vadd.f32 %v535_v9, %v480_v16  ;;  %767 = vtanh.f32 %v289_v14 }
 0x215   :  { %769 = vtanh.f32 %v486_v15 }
 0x216   :  { %771 = vtanh.f32 %v481_v17 }
 0x21d   :  { %v766_v18 = vpop.eup %765 }
 0x21e   :  { %v768_v19 = vpop.eup %767  ;;  %v300_v20 = vmul.f32 0.5, %v766_v18 }
 0x21f   :  { %v770_v21 = vpop.eup %769  ;;  %v299_v22 = vmul.f32 0.5, %v768_v19 }
 0x220   :  { %v772_v23 = vpop.eup %771  ;;  %v302_v24 = vadd.f32 0.5, %v300_v20  ;;  %492 = vst [vmem:[#allocation12 + $0x8] sm:$0xff] %v770_v21 }
 0x221   :  { %v301_v25 = vadd.f32 0.5, %v299_v22  ;;  %491 = vst [vmem:[#allocation12] sm:$0xff] %v772_v23 }
 0x222   :  { %304 = vst [vmem:[#allocation11 + $0x8] sm:$0xff] %v302_v24 }
 0x223   :  { %894 = shalt.err (!%p891_p2)
}
 0x224   :  { %s895_s23 = scalar_lea.hbm %s1153_s10, 256 }
 0x225   :  { %p896_p3 = scmp.ne.s32.totalorder %s1153_s10, %s895_s23  ;;  %p899_p4 = scmp.lt.u32.totalorder %s895_s23, %s1153_s10 }
 0x227   :  { %p901_p5 = pnand %p899_p4, %p896_p3 }
 0x229   :  { %904 = shalt.err (!%p901_p5)
}
 0x22a   :  { %516 = dma.vmem_to_hbm [thread:$0]  %s511_s19, 256, %s1153_s10, [#allocation13], %s939_s25, %s939_s25, %s940_s26   ;;  %303 = vst [vmem:[#allocation11] sm:$0xff] %v301_v25 }
 0x22b   :  { %s905_s5 = scalar_lea.vmem %s1106_s21, 256  ;;  %p910_p7 = scmp.lt.s32.totalorder %s1106_s21, %s1106_s21 }
 0x22c   :  { %p906_p6 = scmp.ne.s32.totalorder %s1106_s21, %s905_s5  ;;  %p911_p8 = scmp.lt.s32.totalorder %s905_s5, %s905_s5 }
 0x22e   :  { %p912_p9 = por %p911_p8, %p910_p7 }
 0x230   :  { %p913_p10 = pnand %p912_p9, %p906_p6 }
 0x232   :  { %916 = shalt.err (!%p913_p10)
}
 0x233   :  { %s917_s3 = scalar_lea.hbm %s1152_s9, 256 }
 0x234   :  { %p918_p11 = scmp.ne.s32.totalorder %s1152_s9, %s917_s3  ;;  %p921_p12 = scmp.lt.u32.totalorder %s917_s3, %s1152_s9 }
 0x236   :  { %p923_p13 = pnand %p921_p12, %p918_p11 }
 0x238   :  { %926 = shalt.err (!%p923_p13)
}
 0x239   :  { %504 = dma.vmem_to_hbm [thread:$0]  %s1106_s21, 256, %s1152_s9, [#allocation4], %s939_s25, %s939_s25, %s940_s26  }
 0x23a   :  { %933 = dma.done.wait [#allocation4], 256  }
 0x23b   :  { %934 = vsyncadd [#allocation4], 4294967040 }
 0x23c   :  { %935 = dma.done.wait [#allocation13], 256  }
 0x23d   :  { %936 = vsyncadd [#allocation13], 4294967040 }
 0x23e   :  { %523 = vsyncpa [#allocation3], 1 }
 0x23f   :  { %524 = vsyncpa [#allocation6], 1 }
 0x240   :  { %525 = vsyncpa [#allocation9], 1 }
 0x241   :  { %526 = vsyncpa [#allocation4], 1 }
 0x242   :  { %527 = vsyncpa [#allocation13], 1 }

</bundles_post_ra>
